<compile_context>
chip_gen: v5e
topology: v5e:2x2
jax: 0.10.0
libtpu: 0.0.40
codegen_flags: <defaults>
</compile_context>

<pallas_src>
import functools

import jax
import jax.numpy as jnp
import numpy as np
from jax.experimental import pallas as pl
from jax.experimental.pallas import tpu as pltpu

STEP = 0.2
SMOOTH = True
NUM_CLASSES = int(round(4 / STEP))   # 20
STEP100 = int(round(STEP * 100))     # 20
_W0, _W1, _W2 = 0.8426, 0.0763, 0.0024   # |delta| == 0, 1, 2


def _edm_loss_kernel(est_ref, tgt_ref, out_ref, *, smooth, batch):
    i = pl.program_id(0)
    est = est_ref[...].astype(jnp.float32)   # [tb, C]
    tgt = tgt_ref[...].astype(jnp.float32)   # [tb, 1]
    tb, C = est.shape

    # floatTensorToOnehot: x_i = trunc(x*100 - 100); clamp to [0, 399]; // 20.
    x_i = (tgt * 100.0 - 100.0).astype(jnp.int32)       # trunc-toward-zero cast
    x_i = jnp.where(x_i >= 400, 399, x_i)
    x_i = jnp.where(x_i <= 0, 0, x_i)
    # integer //20 done as float mul + trunc cast (exact for x_i in [0, 399]).
    cls_idx = (x_i.astype(jnp.float32) * (1.0 / STEP100)).astype(jnp.int32)

    cls = jax.lax.broadcasted_iota(jnp.int32, (tb, C), 1)  # class id per lane
    delta = jnp.abs(cls - cls_idx)                         # [tb, C]

    if smooth:
        # smoothLabel: weight w[|j - idx|] for |j - idx| <= 2, then renormalize.
        w = jnp.where(delta == 0, _W0,
            jnp.where(delta == 1, _W1,
            jnp.where(delta == 2, _W2, 0.0))).astype(jnp.float32)
        tgt_dist = w / jnp.sum(w, axis=-1, keepdims=True)
    else:
        tgt_dist = (delta == 0).astype(jnp.float32)        # plain one-hot

    # cumsum(est) - cumsum(tgt) == cumsum(est - tgt)  (linear).  The C=20 cumsum
    # is a matmul with an upper-triangular ones matrix built in-kernel (no HBM
    # input): tri[i, j] = 1 if i <= j.
    diff = est - tgt_dist
    r = jax.lax.broadcasted_iota(jnp.int32, (C, C), 0)
    c = jax.lax.broadcasted_iota(jnp.int32, (C, C), 1)
    tri = (r <= c).astype(jnp.float32)
    cdf_diff = jnp.dot(diff, tri, preferred_element_type=jnp.float32)  # [tb, C]

    # Per-row sum of squared CDF differences, masked to the true batch rows
    # (padded / out-of-bounds rows contribute exactly zero; select, not mul,
    # so garbage NaN/inf in the padded region cannot leak through).
    row_sum = jnp.sum(cdf_diff * cdf_diff, axis=-1, keepdims=True)     # [tb, 1]
    row = i * tb + jax.lax.broadcasted_iota(jnp.int32, (tb, 1), 0)
    row_sum = jnp.where(row < batch, row_sum, 0.0)

    # Tile partial sum, written lane-dense so every grid step owns its own
    # output block (enables a "parallel" batch axis / both TCs on v7x).
    partial = jnp.sum(row_sum)
    out_ref[...] = jnp.broadcast_to(partial, out_ref.shape)


def edm_loss(p_estimate, p_target, *, smooth=SMOOTH, tile_b=4096):
    if p_target.ndim == 1:
        p_target = p_target[:, None]
    B, C = p_estimate.shape
    assert C == NUM_CLASSES
    assert tile_b % 8 == 0

    # Pad the batch up to a multiple of 8 only when needed (keeps block shapes /
    # matmul sublane-aligned); padded rows are masked inside the kernel.
    B_pad = (B + 7) // 8 * 8
    if B_pad != B:
        p_estimate = jnp.pad(p_estimate, ((0, B_pad - B), (0, 0)))
        p_target = jnp.pad(p_target, ((0, B_pad - B), (0, 0)))

    tb = B_pad if B_pad <= tile_b else tile_b
    num_tiles = pl.cdiv(B_pad, tb)

    kernel = functools.partial(_edm_loss_kernel, smooth=smooth, batch=B)
    partials = pl.pallas_call(
        kernel,
        out_shape=jax.ShapeDtypeStruct((num_tiles, 8, 128), jnp.float32),
        grid=(num_tiles,),
        in_specs=[
            pl.BlockSpec((tb, C), lambda i: (i, 0)),
            pl.BlockSpec((tb, 1), lambda i: (i, 0)),
        ],
        out_specs=pl.BlockSpec((1, 8, 128), lambda i: (i, 0, 0)),
        compiler_params=pltpu.CompilerParams(
            dimension_semantics=("parallel",)),
    )(p_estimate, p_target)

    # Final mean: divide by B*C exactly once (ragged last tile already masked).
    return jnp.sum(partials[:, 0, 0]) / (B * C)


def edm_loss_ref(p_estimate, p_target, *, smooth=SMOOTH):
    """Pure-JAX reference mirroring the PyTorch module (computed in f32)."""
    C = NUM_CLASSES
    est = p_estimate.astype(jnp.float32)
    tgt = p_target.astype(jnp.float32)
    x_i = (tgt * 100.0 - 100.0).astype(jnp.int32)
    x_i = jnp.clip(x_i, 0, 399) // STEP100               # [B, 1]
    idx = x_i[:, 0]
    if smooth:
        d = jnp.abs(jnp.arange(C)[None, :] - idx[:, None])
        w = jnp.where(d == 0, _W0, jnp.where(d == 1, _W1, jnp.where(d == 2, _W2, 0.0)))
        tgt_dist = w / jnp.sum(w, axis=-1, keepdims=True)
    else:
        tgt_dist = jax.nn.one_hot(idx, C, dtype=jnp.float32)
    cdf_t = jnp.cumsum(tgt_dist, axis=1)
    cdf_e = jnp.cumsum(est, axis=1)
    return jnp.mean(jnp.mean((cdf_e - cdf_t) ** 2, axis=-1))


if __name__ == "__main__":
    key = jax.random.PRNGKey(0)
    k1, k2, k3, k4 = jax.random.split(key, 4)

    # Case 1: single tile, B = 8 (f32 inputs).
    B = 8
    p_estimate = jax.nn.softmax(jax.random.normal(k1, (B, NUM_CLASSES), jnp.float32), axis=-1)
    p_target = jax.random.uniform(k2, (B, 1), jnp.float32, minval=1.0, maxval=5.0)
    loss = jax.block_until_ready(edm_loss(p_estimate, p_target))
    ref = jax.block_until_ready(edm_loss_ref(p_estimate, p_target))
    np.testing.assert_allclose(np.asarray(loss), np.asarray(ref), rtol=1e-5, atol=1e-6)

    # Case 2: multi-tile grid with a ragged (masked) last tile: B=40, tile_b=16.
    B2 = 40
    p_estimate2 = jax.nn.softmax(jax.random.normal(k3, (B2, NUM_CLASSES), jnp.float32), axis=-1)
    p_target2 = jax.random.uniform(k4, (B2, 1), jnp.float32, minval=1.0, maxval=5.0)
    loss2 = jax.block_until_ready(edm_loss(p_estimate2, p_target2, tile_b=16))
    ref2 = jax.block_until_ready(edm_loss_ref(p_estimate2, p_target2))
    np.testing.assert_allclose(np.asarray(loss2), np.asarray(ref2), rtol=1e-5, atol=1e-6)

    # Case 3: native-dtype passthrough (bf16 in, f32 compute inside the kernel).
    est_bf16 = p_estimate.astype(jnp.bfloat16)
    tgt_bf16 = p_target.astype(jnp.bfloat16)
    loss3 = jax.block_until_ready(edm_loss(est_bf16, tgt_bf16))
    ref3 = jax.block_until_ready(edm_loss_ref(est_bf16, tgt_bf16))
    np.testing.assert_allclose(np.asarray(loss3), np.asarray(ref3), rtol=1e-4, atol=1e-5)

    print("KERNEL_OK")
</pallas_src>

<mosaic_0001>
module attributes {stable_mosaic.version = 11 : i64} {
  func.func @_edm_loss_kernel(%arg0: i32, %arg1: memref<8x20xf32, #tpu.memory_space<vmem>>, %arg2: memref<8x1xf32, #tpu.memory_space<vmem>>, %arg3: memref<1x8x128xf32, #tpu.memory_space<vmem>>) attributes {dimension_semantics = [#tpu.dimension_semantics<parallel>], iteration_bounds = array<i64: 1>, scalar_prefetch = 0 : i64, scratch_operands = 0 : i64, tpu.core_type = #tpu.core_type<tc>, window_params = [{transform_indices = @transform_0, window_bounds = array<i64: 8, 20>}, {transform_indices = @transform_1, window_bounds = array<i64: 8, 1>}, {transform_indices = @transform_2, window_bounds = array<i64: 1, 8, 128>}]} {
    %c0 = arith.constant 0 : index
    %c0_0 = arith.constant 0 : index
    %0 = vector.load %arg1[%c0, %c0_0] : memref<8x20xf32, #tpu.memory_space<vmem>>, vector<8x20xf32>
    %c0_1 = arith.constant 0 : index
    %c0_2 = arith.constant 0 : index
    %1 = vector.load %arg2[%c0_1, %c0_2] : memref<8x1xf32, #tpu.memory_space<vmem>>, vector<8x1xf32>
    %cst = arith.constant 1.000000e+02 : f32
    %2 = vector.broadcast %cst : f32 to vector<8x1xf32>
    %3 = arith.mulf %1, %2 : vector<8x1xf32>
    %cst_3 = arith.constant 1.000000e+02 : f32
    %4 = vector.broadcast %cst_3 : f32 to vector<8x1xf32>
    %5 = arith.subf %3, %4 : vector<8x1xf32>
    %6 = arith.fptosi %5 : vector<8x1xf32> to vector<8x1xi32>
    %c400_i32 = arith.constant 400 : i32
    %7 = vector.broadcast %c400_i32 : i32 to vector<8x1xi32>
    %8 = arith.cmpi sge, %6, %7 : vector<8x1xi32>
    %c399_i32 = arith.constant 399 : i32
    %9 = vector.broadcast %c399_i32 : i32 to vector<8x1xi32>
    %10 = arith.select %8, %9, %6 : vector<8x1xi1>, vector<8x1xi32>
    %c0_i32 = arith.constant 0 : i32
    %11 = vector.broadcast %c0_i32 : i32 to vector<8x1xi32>
    %12 = arith.cmpi sle, %10, %11 : vector<8x1xi32>
    %c0_i32_4 = arith.constant 0 : i32
    %13 = vector.broadcast %c0_i32_4 : i32 to vector<8x1xi32>
    %14 = arith.select %12, %13, %10 : vector<8x1xi1>, vector<8x1xi32>
    %15 = arith.sitofp %14 : vector<8x1xi32> to vector<8x1xf32>
    %cst_5 = arith.constant 5.000000e-02 : f32
    %16 = vector.broadcast %cst_5 : f32 to vector<8x1xf32>
    %17 = arith.mulf %15, %16 : vector<8x1xf32>
    %18 = arith.fptosi %17 : vector<8x1xf32> to vector<8x1xi32>
    %19 = tpu.iota {dimensions = array<i32: 1>} : vector<8x20xi32>
    %20 = vector.broadcast %18 : vector<8x1xi32> to vector<8x20xi32>
    %21 = arith.subi %19, %20 : vector<8x20xi32>
    %22 = math.absi %21 : vector<8x20xi32>
    %c0_i32_6 = arith.constant 0 : i32
    %23 = vector.broadcast %c0_i32_6 : i32 to vector<8x20xi32>
    %24 = arith.cmpi eq, %22, %23 : vector<8x20xi32>
    %c1_i32 = arith.constant 1 : i32
    %25 = vector.broadcast %c1_i32 : i32 to vector<8x20xi32>
    %26 = arith.cmpi eq, %22, %25 : vector<8x20xi32>
    %c2_i32 = arith.constant 2 : i32
    %27 = vector.broadcast %c2_i32 : i32 to vector<8x20xi32>
    %28 = arith.cmpi eq, %22, %27 : vector<8x20xi32>
    %cst_7 = arith.constant 2.400000e-03 : f32
    %cst_8 = arith.constant 0.000000e+00 : f32
    %29 = vector.broadcast %cst_7 : f32 to vector<8x20xf32>
    %30 = vector.broadcast %cst_8 : f32 to vector<8x20xf32>
    %31 = arith.select %28, %29, %30 : vector<8x20xi1>, vector<8x20xf32>
    %cst_9 = arith.constant 7.630000e-02 : f32
    %32 = vector.broadcast %cst_9 : f32 to vector<8x20xf32>
    %33 = arith.select %26, %32, %31 : vector<8x20xi1>, vector<8x20xf32>
    %cst_10 = arith.constant 0.842599987 : f32
    %34 = vector.broadcast %cst_10 : f32 to vector<8x20xf32>
    %35 = arith.select %24, %34, %33 : vector<8x20xi1>, vector<8x20xf32>
    %cst_11 = arith.constant dense<0.000000e+00> : vector<8xf32>
    %36 = vector.multi_reduction <add>, %35, %cst_11 [1] : vector<8x20xf32> to vector<8xf32>
    %37 = vector.shape_cast %36 : vector<8xf32> to vector<8x1xf32>
    %38 = vector.broadcast %37 : vector<8x1xf32> to vector<8x20xf32>
    %39 = arith.divf %35, %38 : vector<8x20xf32>
    %40 = arith.subf %0, %39 : vector<8x20xf32>
    %41 = tpu.iota {dimensions = array<i32: 0>} : vector<20x20xi32>
    %42 = tpu.iota {dimensions = array<i32: 1>} : vector<20x20xi32>
    %43 = arith.cmpi sle, %41, %42 : vector<20x20xi32>
    %44 = arith.extui %43 : vector<20x20xi1> to vector<20x20xi32>
    %45 = arith.sitofp %44 : vector<20x20xi32> to vector<20x20xf32>
    %cst_12 = arith.constant dense<0.000000e+00> : vector<8x20xf32>
    %46 = tpu.matmul %40, %45, %cst_12 {dimension_numbers = #tpu.dot_dimension_numbers<[1], [0], [0], [1], [0, 0, 1, 1], [], []>} : vector<8x20xf32>, vector<20x20xf32>, vector<8x20xf32> -> vector<8x20xf32>
    %47 = arith.mulf %46, %46 : vector<8x20xf32>
    %cst_13 = arith.constant dense<0.000000e+00> : vector<8xf32>
    %48 = vector.multi_reduction <add>, %47, %cst_13 [1] : vector<8x20xf32> to vector<8xf32>
    %49 = vector.shape_cast %48 : vector<8xf32> to vector<8x1xf32>
    %c8_i32 = arith.constant 8 : i32
    %50 = arith.muli %arg0, %c8_i32 : i32
    %51 = tpu.iota {dimensions = array<i32: 0>} : vector<8x1xi32>
    %52 = vector.broadcast %50 : i32 to vector<8x1xi32>
    %53 = arith.addi %52, %51 : vector<8x1xi32>
    %c8_i32_14 = arith.constant 8 : i32
    %54 = vector.broadcast %c8_i32_14 : i32 to vector<8x1xi32>
    %55 = arith.cmpi slt, %53, %54 : vector<8x1xi32>
    %cst_15 = arith.constant 0.000000e+00 : f32
    %56 = vector.broadcast %cst_15 : f32 to vector<8x1xf32>
    %57 = arith.select %55, %49, %56 : vector<8x1xi1>, vector<8x1xf32>
    %58 = vector.shape_cast %57 : vector<8x1xf32> to vector<1x8x1xf32>
    %cst_16 = arith.constant dense<0.000000e+00> : vector<1xf32>
    %59 = vector.multi_reduction <add>, %58, %cst_16 [1, 2] : vector<1x8x1xf32> to vector<1xf32>
    %60 = vector.shape_cast %59 : vector<1xf32> to vector<1x1x1xf32>
    %61 = vector.extract %60[0, 0, 0] : f32 from vector<1x1x1xf32>
    %62 = vector.broadcast %61 : f32 to vector<1x8x128xf32>
    %c0_17 = arith.constant 0 : index
    %c0_18 = arith.constant 0 : index
    %c0_19 = arith.constant 0 : index
    %63 = vector.load %arg3[%c0_17, %c0_18, %c0_19] : memref<1x8x128xf32, #tpu.memory_space<vmem>>, vector<1x8x128xf32>
    tpu.vector_store %arg3[%c0_17, %c0_18, %c0_19], %62 {strides = array<i32>} : memref<1x8x128xf32, #tpu.memory_space<vmem>>, vector<1x8x128xf32>,
    return
  }
  func.func @transform_0(%arg0: i32) -> (i32, i32) {
    %c0_i32 = arith.constant 0 : i32
    %c0_i32_0 = arith.constant 0 : i32
    return %arg0, %c0_i32 : i32, i32
  }
  func.func @transform_1(%arg0: i32) -> (i32, i32) {
    %c0_i32 = arith.constant 0 : i32
    %c0_i32_0 = arith.constant 0 : i32
    return %arg0, %c0_i32 : i32, i32
  }
  func.func @transform_2(%arg0: i32) -> (i32, i32, i32) {
    %c0_i32 = arith.constant 0 : i32
    %c0_i32_0 = arith.constant 0 : i32
    %c0_i32_1 = arith.constant 0 : i32
    return %arg0, %c0_i32, %c0_i32_0 : i32, i32, i32
  }
}

</mosaic_0001>

<bundles_post_ra>
// kernel: tpu_custom_call.1
= control target key start
LH: loop header
LB: loop body
LE: loop exit
PB: predicated region body
PF: predicated region fallthrough
CT: control target
= control target key end

     0   :  { %s223_s0 = inlined_call_operand.vmem [shape: f32[8,20], index: 0, kind: input, shape index: {}]   ;;  %s224_s1 = inlined_call_operand.vmem [shape: f32[8,1], index: 1, kind: input, shape index: {}]   ;;  %s225_s2 = inlined_call_operand.hbm [shape: f32[1,8,128], index: 2, kind: output, shape index: {}]  }
   0x1   :  { %v13_v0 = vld [vmem:[%s224_s1] sm:$0xff] }
   0x2   :  { %7 = vsyncpa [#allocation3], 0  ;;  %v192_v1 = vmov 0   ;;  %v14_v2 = vmul.f32 100.0, %v13_v0  ;;  %v24_v16 = vlaneseq  ;;  %v193_v22 = vmov 0.0   ;;  %v12_v42 = vld [vmem:[%s223_s0] sm:$0xff] }
   0x3   :  { %163 = vset.pattern.permute.xlu0 %v192_v1  ;;  %vm39_vm7 = vcmask 162816   ;;  %vm75_vm10 = vcmask 1043456   ;;  %v194_v31 = vmov 1.0   ;;  %s195_s0 = smov [#allocation2]   ;;  %s128_s15 = sshll.u32 %s225_s2, 4  ;;  %s129_s15 = int_to_ptr.hbm [resolvable:$true] %s128_s15 }
   0x4   :  { %v137_v3 = vadd.f32 -100.0, %v14_v2  ;;  %v25_v17 = vand.u32 127, %v24_v16  ;;  %v60_v27 = vshrl.u32 %v24_v16, 7  ;;  %s126_s12 = sshll.u32 %s195_s0, 4  ;;  %s127_s12 = int_to_ptr.vmem [resolvable:$true] %s126_s12 }
   0x6   :  { %vm147_vm0 = vcmp.lt.s32.totalorder %v137_v3, 0  ;;  %v148_v4 = vceil.f32 %v137_v3  ;;  %v149_v5 = vfloor.f32 %v137_v3  ;;  %v62_v28 = vadd.s32 16, %v60_v27 }
   0x7   :  { %v61_v30 = vadd.s32 8, %v60_v27  ;;  %vm63_vm12 = vcmp.le.s32.totalorder %v60_v27, %v25_v17 }
   0x8   :  { %v150_v6 = vsel %vm147_vm0, %v148_v4, %v149_v5  ;;  %vm65_vm9 = vcmp.le.s32.totalorder %v62_v28, %v25_v17 }
   0x9   :  { %v151_v7 = vcvt.f32.s32 %v150_v6  ;;  %v142_v29 = vsel %vm65_vm9, 1.0, %v193_v22  ;;  %vm64_vm11 = vcmp.le.s32.totalorder %v61_v30, %v25_v17 }
   0xa   :  { %143 = vmatpush.msk.msra.mxu0 %vm75_vm10, %v142_v29 }
   0xb   :  { %vm17_vm1 = vcmp.ge.s32.totalorder %v151_v7, 400 }
   0xc   :  { %v18_v8 = vsel %vm17_vm1, 399, %v151_v7  ;;  %144 = vmatpush.msk.msra.mxu0 %vm64_vm11, %v194_v31  ;;  %vm108_vm1 = vcmask 7168  }
   0xd   :  { %vm19_vm2 = vcmp.le.s32.totalorder %v18_v8, 0  ;;  %v138_v9 = vcvt.s32.f32 %v18_v8 }
   0xe   :  { %145 = vmatpush.msk.msra.mxu0 %vm63_vm12, %v194_v31 }
   0xf   :  { %v139_v10 = vsel %vm19_vm2, 0.0, %v138_v9 }
  0x10   :  { %v22_v11 = vmul.f32 0.05, %v139_v10 }
  0x12   :  { %vm152_vm3 = vcmp.lt.s32.totalorder %v22_v11, 0  ;;  %v153_v12 = vceil.f32 %v22_v11  ;;  %v154_v13 = vfloor.f32 %v22_v11 }
  0x14   :  { %v155_v14 = vsel %vm152_vm3, %v153_v12, %v154_v13 }
  0x15   :  { %v156_v15 = vcvt.f32.s32 %v155_v14 }
  0x17   :  { %27 = vperm.xlu0 %163, %v156_v15  }
  0x89   :  { %v28_v18 = vpop.permute.xlu0 %27 }
  0x8a   :  { %v29_v19 = vsub.s32 %v25_v17, %v28_v18 }
  0x8c   :  { %vm30_vm4 = vcmp.lt.s32.totalorder %v29_v19, 0  ;;  %v31_v20 = vsub.s32 0, %v29_v19 }
  0x8e   :  { %v32_v21 = vsel %vm30_vm4, %v31_v20, %v29_v19 }
  0x8f   :  { %vm34_vm5 = vcmp.eq.s32.totalorder %v32_v21, 1  ;;  %vm35_vm6 = vcmp.eq.s32.totalorder %v32_v21, 2  ;;  %vm33_vm8 = vcmp.eq.s32.totalorder %v32_v21, 0 }
  0x90   :  { %v36_v23 = vsel %vm35_vm6, 0.0024, %v193_v22 }
  0x91   :  { %v37_v24 = vsel %vm34_vm5, 0.0763, %v36_v23 }
  0x92   :  { %v38_v25 = vsel %vm33_vm8, 0.8426, %v37_v24 }
  0x93   :  { %v40_v26 = vsel %vm39_vm7, %v38_v25, 0.0 }
  0x94   :  { %41 = vadd.xlane.f32.xlu0 %v40_v26 }
 0x107   :  { %v42_v32 = vpop.xlane.xlu0 %41 }
 0x108   :  { %164 = vrcp.f32 %v42_v32  ;;  %v54_v36 = vand.u32 2147483648, %v42_v32  ;;  %v52_v38 = vand.u32 2147483647, %v42_v32  ;;  %vm48_vm14 = vweird.f32 %v42_v32 }
 0x10a   :  { %v55_v40 = vor.u32 1.1754944e-38, %v54_v36  ;;  %vm53_vm0 = vcmp.eq.f32.partialorder %v52_v38, 8.507059e+37 }
 0x10e   :  { %v165_v33 = vpop.eup %164 }
 0x10f   :  { %v44_v34 = vmul.f32 %v165_v33, %v42_v32  ;;  %vm49_vm13 = vweird.f32 %v165_v33 }
 0x110   :  { %vm50_vm15 = vmor %vm48_vm14, %vm49_vm13 }
 0x111   :  { %v45_v35 = vsub.f32 1.0, %v44_v34 }
 0x113   :  { %v46_v37 = vmul.f32 %v165_v33, %v45_v35 }
 0x115   :  { %v47_v39 = vadd.f32 %v165_v33, %v46_v37 }
 0x117   :  { %v51_v41 = vsel %vm50_vm15, %v165_v33, %v47_v39 }
 0x118   :  { %v56_v43 = vsel %vm53_vm0, %v55_v40, %v51_v41 }
 0x119   :  { %v57_v44 = vmul.f32 %v56_v43, %v38_v25 }
 0x11b   :  { %v58_v45 = vsub.f32 %v12_v42, %v57_v44 }
 0x11d   :  { %146 = vmatmul.msk.f32.vlgmr.msra.gmra.mxu0 %vm39_vm7, %v58_v45 }
 0x19a   :  { %v96_v46 = vpop.f32.mrf.mxu0 }
 0x19b   :  { %v99_v47 = vmul.f32 %v96_v46, %v96_v46 }
 0x19d   :  { %v100_v48 = vsel %vm39_vm7, %v99_v47, 0.0 }
 0x19e   :  { %101 = vadd.xlane.f32.xlu1 %v100_v48 }
 0x211   :  { %v102_v49 = vpop.xlane.xlu1 %101 }
 0x212   :  { %v109_v50 = vsel %vm108_vm1, %v102_v49, 0.0 }
 0x213   :  { %110 = vadd.xlane.f32.xlu1 %v109_v50 }
 0x286   :  { %v111_v51 = vpop.xlane.xlu1 %110 }
 0x287   :  { %v112_v52 = vrot.slane %v111_v51, 4 }
 0x289   :  { %v113_v53 = vadd.f32 %v112_v52, %v111_v51 }
 0x28b   :  { %v114_v54 = vrot.slane %v113_v53, 2 }
 0x28d   :  { %v115_v55 = vadd.f32 %v114_v54, %v113_v53 }
 0x28f   :  { %v116_v56 = vrot.slane %v115_v55, 1 }
 0x291   :  { %v117_v57 = vadd.f32 %v116_v56, %v115_v55 }
 0x293   :  { %157 = vpush %v117_v57 }
 0x2c4   :  { %s158_s16 = spop %157 }
 0x2c5   :  { %v119_v58 = vstv %s158_s16 }
 0x2c6   :  { %120 = vst [vmem:[#allocation2] sm:$0xff] %v119_v58 }
 0x2c7   :  { %131 = dma.vmem_to_hbm [thread:$0]  %s127_s12, 128, %s129_s15, [#allocation3]  }
 0x2c8   :  { %190 = dma.done.wait [#allocation3], 128  }
 0x2c9   :  { %191 = vsyncadd [#allocation3], 4294967168 }
 0x2ca   :  { %136 = vsyncpa [#allocation3], 1 }

</bundles_post_ra>
